<compile_context>
chip_gen: v6e
topology: v6e:2x2x1
jax: 0.10.0
libtpu: 0.0.40
codegen_flags: <defaults>
</compile_context>

<pallas_src>
import math
import functools

import jax
import jax.numpy as jnp
from jax import lax
from jax.experimental import pallas as pl
from jax.experimental.pallas import tpu as pltpu


def _round_up(x: int, m: int) -> int:
    return ((x + m - 1) // m) * m


def _pad_to(arr, target_shape):
    pads = [(0, t - s) for s, t in zip(arr.shape, target_shape)]
    if any(p[1] for p in pads):
        return jnp.pad(arr, pads)
    return arr


def _linear_kernel(x_ref, w_ref, b_ref, o_ref, acc_ref):
    """One (tm, tn) output tile, reduced over the K grid axis.

    x_ref: (tm, tk)   activation tile
    w_ref: (tn, tk)   weight tile in stored (out, in) layout
    b_ref: (1, tn)    bias tile
    o_ref: (tm, tn)   output tile
    acc_ref: (tm, tn) f32 accumulator scratch (resident across K steps)
    """
    k = pl.program_id(2)

    @pl.when(k == 0)
    def _():
        acc_ref[...] = jnp.zeros_like(acc_ref)

    # Contract x (tm, tk) with w (tn, tk) along the K dim of both -> (tm, tn).
    acc_ref[...] += lax.dot_general(
        x_ref[...],
        w_ref[...],
        dimension_numbers=(((1,), (1,)), ((), ())),
        preferred_element_type=jnp.float32,
    )

    @pl.when(k == pl.num_programs(2) - 1)
    def _():
        # Bias add + cast only once per output tile (off the K inner loop).
        o_ref[...] = (acc_ref[...] + b_ref[...].astype(jnp.float32)).astype(
            o_ref.dtype
        )


@functools.partial(jax.jit, static_argnames=("tm", "tn", "tk"))
def my_linear_forward(x, weight, bias, *, tm=256, tn=256, tk=512):
    """x: (seq, b, in_features); weight: (out_features, in_features); bias: (out_features,)"""
    seq, b, K = x.shape
    N = weight.shape[0]
    M = seq * b

    # Clamp the target tile sizes to the (alignment-rounded) problem dims so
    # small problems don't over-pad; keeps tm a multiple of 8 and tn/tk
    # multiples of 128 (lane-dense output, (8,128)-aligned blocks).
    tm = min(tm, _round_up(M, 8))
    tn = min(tn, _round_up(N, 128))
    tk = min(tk, _round_up(K, 128))

    Mp = _round_up(M, tm)
    Np = _round_up(N, tn)
    Kp = _round_up(K, tk)

    x2d = _pad_to(x.reshape(M, K), (Mp, Kp))
    w_pad = _pad_to(weight, (Np, Kp))                 # stored layout, no transpose
    bias2d = _pad_to(bias.reshape(1, N), (1, Np))

    grid = (Mp // tm, Np // tn, Kp // tk)

    out_pad = pl.pallas_call(
        _linear_kernel,
        out_shape=jax.ShapeDtypeStruct((Mp, Np), x.dtype),
        grid_spec=pltpu.PrefetchScalarGridSpec(
            num_scalar_prefetch=0,
            grid=grid,
            in_specs=[
                pl.BlockSpec((tm, tk), lambda i, j, k: (i, k)),   # x
                pl.BlockSpec((tn, tk), lambda i, j, k: (j, k)),   # weight (out, in)
                pl.BlockSpec((1, tn), lambda i, j, k: (0, j)),    # bias
            ],
            out_specs=pl.BlockSpec((tm, tn), lambda i, j, k: (i, j)),
            scratch_shapes=[pltpu.VMEM((tm, tn), jnp.float32)],
        ),
        compiler_params=pltpu.CompilerParams(
            dimension_semantics=("parallel", "parallel", "arbitrary"),
        ),
        cost_estimate=pl.CostEstimate(
            flops=2 * Mp * Kp * Np,
            transcendentals=0,
            bytes_accessed=(
                Mp * Kp * x.dtype.itemsize
                + Np * Kp * weight.dtype.itemsize
                + Np * bias.dtype.itemsize
                + Mp * Np * x.dtype.itemsize
            ),
        ),
    )(x2d, w_pad, bias2d)

    # Strip padding and restore (seq, b, out_features).
    return out_pad[:M, :N].reshape(seq, b, N)


def init_params(key, in_features, out_features, dtype=jnp.float32):
    """Deterministic re-implementation of MyLinear.reset_parameters.

    kaiming_uniform_(a=sqrt(5)) on weight (fan_in = in_features) reduces to
    uniform(-1/sqrt(fan_in), 1/sqrt(fan_in)); bias uses the same bound.
    """
    kw, kb = jax.random.split(key)
    bound = 1.0 / math.sqrt(in_features)
    weight = jax.random.uniform(
        kw, (out_features, in_features), dtype=dtype, minval=-bound, maxval=bound
    )
    bias = jax.random.uniform(
        kb, (out_features,), dtype=dtype, minval=-bound, maxval=bound
    )
    return weight, bias


if __name__ == "__main__":
    key = jax.random.PRNGKey(0)
    k_in, k_param = jax.random.split(key)

    seq, b, in_features, out_features = 8, 2, 32, 64
    x = jax.random.normal(k_in, (seq, b, in_features), dtype=jnp.float32)
    weight, bias = init_params(k_param, in_features, out_features)

    out = my_linear_forward(x, weight, bias)
    out = jax.block_until_ready(out)

    # Pure-JAX reference check (same semantics as torch.matmul + bias).
    ref = (x.reshape(seq * b, in_features) @ weight.T + bias).reshape(
        seq, b, out_features
    )
    assert out.shape == (seq, b, out_features)
    assert jnp.allclose(out, ref, atol=1e-4, rtol=1e-4)

    print("KERNEL_OK")
</pallas_src>

<mosaic_0001>
module attributes {stable_mosaic.version = 11 : i64} {
  func.func @_linear_kernel(%arg0: i32, %arg1: i32, %arg2: i32, %arg3: memref<16x128xf32, #tpu.memory_space<vmem>>, %arg4: memref<128x128xf32, #tpu.memory_space<vmem>>, %arg5: memref<1x128xf32, #tpu.memory_space<vmem>>, %arg6: memref<16x128xf32, #tpu.memory_space<vmem>>, %arg7: memref<16x128xf32, #tpu.memory_space<vmem>>) attributes {dimension_semantics = [#tpu.dimension_semantics<parallel>, #tpu.dimension_semantics<parallel>, #tpu.dimension_semantics<arbitrary>], iteration_bounds = array<i64: 1, 1, 1>, scalar_prefetch = 0 : i64, scratch_operands = 1 : i64, tpu.core_type = #tpu.core_type<tc>, window_params = [{transform_indices = @transform_0, window_bounds = array<i64: 16, 128>}, {transform_indices = @transform_1, window_bounds = array<i64: 128, 128>}, {transform_indices = @transform_2, window_bounds = array<i64: 1, 128>}, {transform_indices = @transform_3, window_bounds = array<i64: 16, 128>}]} {
    %c0_i32 = arith.constant 0 : i32
    %0 = arith.cmpi eq, %arg2, %c0_i32 : i32
    %1 = arith.extui %0 : i1 to i32
    %c0_i32_0 = arith.constant 0 : i32
    %2 = arith.cmpi ne, %1, %c0_i32_0 : i32
    scf.if %2 {
      %cst_10 = arith.constant 0.000000e+00 : f32
      %12 = vector.broadcast %cst_10 : f32 to vector<16x128xf32>
      %c0_11 = arith.constant 0 : index
      %c0_12 = arith.constant 0 : index
      %13 = vector.load %arg7[%c0_11, %c0_12] : memref<16x128xf32, #tpu.memory_space<vmem>>, vector<16x128xf32>
      tpu.vector_store %arg7[%c0_11, %c0_12], %12 {strides = array<i32>} : memref<16x128xf32, #tpu.memory_space<vmem>>, vector<16x128xf32>,
    } else {
    }
    %c0 = arith.constant 0 : index
    %c0_1 = arith.constant 0 : index
    %3 = vector.load %arg7[%c0, %c0_1] : memref<16x128xf32, #tpu.memory_space<vmem>>, vector<16x128xf32>
    %c0_2 = arith.constant 0 : index
    %c0_3 = arith.constant 0 : index
    %4 = vector.load %arg3[%c0_2, %c0_3] : memref<16x128xf32, #tpu.memory_space<vmem>>, vector<16x128xf32>
    %c0_4 = arith.constant 0 : index
    %c0_5 = arith.constant 0 : index
    %5 = vector.load %arg4[%c0_4, %c0_5] : memref<128x128xf32, #tpu.memory_space<vmem>>, vector<128x128xf32>
    %cst = arith.constant dense<0.000000e+00> : vector<16x128xf32>
    %6 = tpu.matmul %4, %5, %cst {dimension_numbers = #tpu.dot_dimension_numbers<[1], [1], [0], [0], [0, 0, 1, 0], [], []>} : vector<16x128xf32>, vector<128x128xf32>, vector<16x128xf32> -> vector<16x128xf32>
    %7 = arith.addf %3, %6 : vector<16x128xf32>
    %c0_6 = arith.constant 0 : index
    %c0_7 = arith.constant 0 : index
    %8 = vector.load %arg7[%c0_6, %c0_7] : memref<16x128xf32, #tpu.memory_space<vmem>>, vector<16x128xf32>
    tpu.vector_store %arg7[%c0_6, %c0_7], %7 {strides = array<i32>} : memref<16x128xf32, #tpu.memory_space<vmem>>, vector<16x128xf32>,
    %c0_i32_8 = arith.constant 0 : i32
    %9 = arith.cmpi eq, %arg2, %c0_i32_8 : i32
    %10 = arith.extui %9 : i1 to i32
    %c0_i32_9 = arith.constant 0 : i32
    %11 = arith.cmpi ne, %10, %c0_i32_9 : i32
    scf.if %11 {
      %c0_10 = arith.constant 0 : index
      %c0_11 = arith.constant 0 : index
      %12 = vector.load %arg7[%c0_10, %c0_11] : memref<16x128xf32, #tpu.memory_space<vmem>>, vector<16x128xf32>
      %c0_12 = arith.constant 0 : index
      %c0_13 = arith.constant 0 : index
      %13 = vector.load %arg5[%c0_12, %c0_13] : memref<1x128xf32, #tpu.memory_space<vmem>>, vector<1x128xf32>
      %14 = vector.broadcast %13 : vector<1x128xf32> to vector<16x128xf32>
      %15 = arith.addf %12, %14 : vector<16x128xf32>
      %c0_14 = arith.constant 0 : index
      %c0_15 = arith.constant 0 : index
      %16 = vector.load %arg6[%c0_14, %c0_15] : memref<16x128xf32, #tpu.memory_space<vmem>>, vector<16x128xf32>
      tpu.vector_store %arg6[%c0_14, %c0_15], %15 {strides = array<i32>} : memref<16x128xf32, #tpu.memory_space<vmem>>, vector<16x128xf32>,
    } else {
    }
    return
  }
  func.func @transform_0(%arg0: i32, %arg1: i32, %arg2: i32) -> (i32, i32) {
    %c0_i32 = arith.constant 0 : i32
    return %arg0, %arg2 : i32, i32
  }
  func.func @transform_1(%arg0: i32, %arg1: i32, %arg2: i32) -> (i32, i32) {
    %c0_i32 = arith.constant 0 : i32
    return %arg1, %arg2 : i32, i32
  }
  func.func @transform_2(%arg0: i32, %arg1: i32, %arg2: i32) -> (i32, i32) {
    %c0_i32 = arith.constant 0 : i32
    %c0_i32_0 = arith.constant 0 : i32
    return %c0_i32, %arg1 : i32, i32
  }
  func.func @transform_3(%arg0: i32, %arg1: i32, %arg2: i32) -> (i32, i32) {
    %c0_i32 = arith.constant 0 : i32
    return %arg0, %arg1 : i32, i32
  }
}

</mosaic_0001>

<bundles_post_ra>
// kernel: my_linear_forward.1
= control target key start
LH: loop header
LB: loop body
LE: loop exit
PB: predicated region body
PF: predicated region fallthrough
CT: control target
= control target key end

     0   :  { %s314_s0 = inlined_call_operand.vmem [shape: f32[16,128], index: 0, kind: input, shape index: {}]   ;;  %s315_s1 = inlined_call_operand.vmem [shape: f32[128,128], index: 1, kind: input, shape index: {}]   ;;  %s316_s2 = inlined_call_operand.vmem [shape: f32[1,128], index: 2, kind: input, shape index: {}]   ;;  %s317_s3 = inlined_call_operand.hbm [shape: f32[16,128], index: 3, kind: output, shape index: {}]  }
   0x1   :  { %v40_v0 = vld [vmem:[%s315_s1 + $0x78] sm:$0xff]  ;;  %v39_v1 = vld [vmem:[%s315_s1 + $0x70] sm:$0xff]  ;;  %v38_v2 = vld [vmem:[%s315_s1 + $0x68] sm:$0xff] }
   0x2   :  { %171 = vmatprep.subr.mxu0 %v40_v0  ;;  %v23_v3 = vld [vmem:[%s314_s0] sm:$0xff] }
   0x3   :  { %172 = vmatpush3.xpose.msra.mxu0 %v40_v0  ;;  %203 = vmatprep.mubr.f32.mxu0 %v23_v3 }
   0x4   :  { %173 = vmatprep.subr.mxu0 %v39_v1 }
   0x7   :  { %174 = vmatpush3.xpose.msra.mxu0 %v39_v1 }
   0x8   :  { %8 = vsyncpa [#allocation4], 0  ;;  %175 = vmatprep.subr.mxu0 %v38_v2  ;;  %v37_v4 = vld [vmem:[%s315_s1 + $0x60] sm:$0xff]  ;;  %v36_v5 = vld [vmem:[%s315_s1 + $0x58] sm:$0xff]  ;;  %s231_s23 = smov [#allocation3]  }
   0x9   :  { %v35_v6 = vld [vmem:[%s315_s1 + $0x50] sm:$0xff]  ;;  %v34_v7 = vld [vmem:[%s315_s1 + $0x48] sm:$0xff]  ;;  %v33_v8 = vld [vmem:[%s315_s1 + $0x40] sm:$0xff]  ;;  %s141_s24 = sshll.u32 %s231_s23, 4  ;;  %s142_s24 = int_to_ptr.vmem [resolvable:$true] %s141_s24 }
   0xa   :  { %v32_v9 = vld [vmem:[%s315_s1 + $0x38] sm:$0xff]  ;;  %v31_v10 = vld [vmem:[%s315_s1 + $0x30] sm:$0xff]  ;;  %v30_v11 = vld [vmem:[%s315_s1 + $0x28] sm:$0xff]  ;;  %p214_p1 = scmp.lt.s32.totalorder %s142_s24, %s142_s24 }
   0xb   :  { %176 = vmatpush3.xpose.msra.mxu0 %v38_v2  ;;  %v29_v12 = vld [vmem:[%s315_s1 + $0x20] sm:$0xff]  ;;  %v28_v13 = vld [vmem:[%s315_s1 + $0x18] sm:$0xff]  ;;  %v27_v14 = vld [vmem:[%s315_s1 + $0x10] sm:$0xff] }
   0xc   :  { %177 = vmatprep.subr.mxu0 %v37_v4  ;;  %v26_v15 = vld [vmem:[%s315_s1 + $0x8] sm:$0xff]  ;;  %v25_v16 = vld [vmem:[%s315_s1] sm:$0xff]  ;;  %s209_s1 = scalar_lea.vmem %s142_s24, 256 }
   0xd   :  { %v24_v17 = vld [vmem:[%s314_s0 + $0x8] sm:$0xff]  ;;  %v152_v18 = vld [vmem:[%s316_s2] ss:$0 sm:$0xff]  ;;  %p210_p0 = scmp.ne.s32.totalorder %s142_s24, %s209_s1  ;;  %p215_p2 = scmp.lt.s32.totalorder %s209_s1, %s209_s1 }
   0xf   :  { %178 = vmatpush3.xpose.msra.mxu0 %v37_v4  ;;  %p216_p3 = por %p215_p2, %p214_p1 }
  0x10   :  { %179 = vmatprep.subr.mxu0 %v36_v5 }
  0x11   :  { %p217_p4 = pnand %p216_p3, %p210_p0 }
  0x13   :  { %180 = vmatpush3.xpose.msra.mxu0 %v36_v5 }
  0x14   :  { %181 = vmatprep.subr.mxu0 %v35_v6 }
  0x17   :  { %182 = vmatpush3.xpose.msra.mxu0 %v35_v6 }
  0x18   :  { %183 = vmatprep.subr.mxu0 %v34_v7 }
  0x1b   :  { %184 = vmatpush3.xpose.msra.mxu0 %v34_v7 }
  0x1c   :  { %185 = vmatprep.subr.mxu0 %v33_v8 }
  0x1f   :  { %186 = vmatpush3.xpose.msra.mxu0 %v33_v8 }
  0x20   :  { %187 = vmatprep.subr.mxu0 %v32_v9 }
  0x23   :  { %188 = vmatpush3.xpose.msra.mxu0 %v32_v9 }
  0x24   :  { %189 = vmatprep.subr.mxu0 %v31_v10 }
  0x27   :  { %190 = vmatpush3.xpose.msra.mxu0 %v31_v10 }
  0x28   :  { %191 = vmatprep.subr.mxu0 %v30_v11 }
  0x2b   :  { %192 = vmatpush3.xpose.msra.mxu0 %v30_v11 }
  0x2c   :  { %193 = vmatprep.subr.mxu0 %v29_v12 }
  0x2f   :  { %194 = vmatpush3.xpose.msra.mxu0 %v29_v12 }
  0x30   :  { %195 = vmatprep.subr.mxu0 %v28_v13 }
  0x33   :  { %196 = vmatpush3.xpose.msra.mxu0 %v28_v13 }
  0x34   :  { %197 = vmatprep.subr.mxu0 %v27_v14 }
  0x37   :  { %198 = vmatpush3.xpose.msra.mxu0 %v27_v14 }
  0x38   :  { %199 = vmatprep.subr.mxu0 %v26_v15 }
  0x3b   :  { %200 = vmatpush3.xpose.msra.mxu0 %v26_v15 }
  0x3c   :  { %201 = vmatprep.subr.mxu0 %v25_v16 }
  0x3f   :  { %202 = vmatpush3.xpose.msra.mxu0 %v25_v16 }
  0x42   :  { %204 = vmatmul.mubr.f32.vlgmr.msra.gmra.mxu0 %v24_v17 }
 0x102   :  { %v205_v19 = vpop.f32.mrf.mxu0 }
 0x103   :  { %v133_v20 = vadd.f32 %v205_v19, %v152_v18 }
 0x104   :  { %v107_v21 = vpop.f32.mrf.mxu0 }
 0x105   :  { %135 = vst [vmem:[#allocation3 + $0x8] sm:$0xff] %v133_v20  ;;  %v132_v22 = vadd.f32 %v152_v18, %v107_v21 }
 0x107   :  { %134 = vst [vmem:[#allocation3] sm:$0xff] %v132_v22 }
 0x108   :  { %220 = shalt.err (!%p217_p4)
}
 0x109   :  { %s232_s0 = smov 128   ;;  %s233_s25 = smov 8  }
 0x10a   :  { %147 = dma.vmem_to_hbm [thread:$0]  %s142_s24, 256, %s317_s3, [#allocation4], %s232_s0, %s232_s0, %s233_s25  }
 0x10b   :  { %229 = dma.done.wait [#allocation4], 256  }
 0x10c   :  { %230 = vsyncadd [#allocation4], 4294967040 }
 0x10d   :  { %151 = vsyncpa [#allocation4], 1 }

</bundles_post_ra>
